<compile_context>
chip_gen: v7x
topology: tpu7x:2x2x1
jax: 0.10.0
libtpu: 0.0.40
codegen_flags: <defaults>
</compile_context>

<pallas_src>
import functools

import jax
import jax.numpy as jnp
from jax.experimental import pallas as pl
from jax.experimental.pallas import tpu as pltpu


def _ls_ce_kernel(x_ref, t_ref, o_ref, *, confidence, smoothing, n_total,
                  c_total, tile_n):
    # x_ref: (TILE_N, C) logits block; t_ref: (TILE_N, 1) int32 labels;
    # o_ref: (8, 1) f32 per-tile partial sum (row 0 = sum, rows 1-7 = 0).
    i = pl.program_id(0)

    # Cast per-consumer; no-op for f32 inputs.  For bf16 inputs the f32
    # intermediates are what _pick_tile_n budgets for.
    xf = x_ref[...].astype(jnp.float32)                          # (TILE_N, C)

    # Numerically-stable logsumexp per row (f32 accumulation).
    m = jnp.max(xf, axis=-1, keepdims=True)                      # (TILE_N, 1)
    e_sum = jnp.sum(jnp.exp(xf - m), axis=-1, keepdims=True)     # (TILE_N, 1)
    lse = m + jnp.log(e_sum)                                     # (TILE_N, 1)

    # Fused target-gather + class-mean:
    #   loss_row = conf*(lse - x[t]) + smooth*(lse - mean(x))
    #            = lse - sum_c x_c * (conf*1[c==t] + smooth/C)
    col = jax.lax.broadcasted_iota(jnp.int32, xf.shape, 1)       # (TILE_N, C)
    onehot = col == t_ref[...]                                   # bcast (TILE_N,1)
    low = smoothing / c_total
    w = jnp.where(onehot, confidence + low, low)                 # (TILE_N, C)
    wsum = jnp.sum(xf * w, axis=-1, keepdims=True)               # (TILE_N, 1)

    loss = lse - wsum                                            # (TILE_N, 1)

    # Mask rows of a ragged final tile LAST (zeroes padded-row garbage/NaN).
    row = jax.lax.broadcasted_iota(jnp.int32, loss.shape, 0) + i * tile_n
    loss = jnp.where(row < n_total, loss, 0.0)

    # Per-tile partial sum -> one tiny store instead of per-row column stores.
    part = jnp.sum(loss, axis=0, keepdims=True)                  # (1, 1)
    out_row = jax.lax.broadcasted_iota(jnp.int32, (8, 1), 0)
    o_ref[...] = jnp.where(out_row == 0, part, 0.0)


def _pick_tile_n(n, c):
    # Budget by the f32 working set (intermediates are f32 even for bf16
    # logits): ~4 MiB per live (TILE_N, C) block.  With double-buffered input
    # tiles plus fused elementwise temps this stays inside the 48 MiB scoped
    # VMEM limit set below on v5e/v6e (128 MiB physical) and v7x (64 MiB).
    # TODO(synk): for vocab-scale C (>= ~32k) add a second "arbitrary" grid
    # axis over C with an online logsumexp + running weighted sum in scratch.
    budget_bytes = 4 * 1024 * 1024
    rows = max(8, budget_bytes // (c * 4))
    tile = min(n, rows)
    if tile < n:
        tile = max(8, (tile // 8) * 8)        # sublane-aligned blocks
    elif n >= 16:
        # A single tile would cover all rows: split so the "parallel" grid
        # axis has >= 2 steps and shards across both TensorCores on v7x.
        half = (n + 1) // 2
        tile = ((half + 7) // 8) * 8
    return tile


def label_smoothing_cross_entropy(x, target, smoothing=0.1, tile_n=None):
    """x: (N, C) float logits, target: (N,) int labels -> scalar f32 loss."""
    assert smoothing < 1.0
    n, c = x.shape
    confidence = 1.0 - smoothing
    if tile_n is None:
        tile_n = _pick_tile_n(n, c)
    num_tiles = pl.cdiv(n, tile_n)
    t2 = target.astype(jnp.int32).reshape(n, 1)

    cost = pl.CostEstimate(
        flops=5 * n * c,
        transcendentals=n * c,
        bytes_accessed=n * c * x.dtype.itemsize + n * 4 + num_tiles * 8 * 4,
    )

    per_tile = pl.pallas_call(
        functools.partial(
            _ls_ce_kernel,
            confidence=confidence,
            smoothing=smoothing,
            n_total=n,
            c_total=c,
            tile_n=tile_n,
        ),
        out_shape=jax.ShapeDtypeStruct((num_tiles * 8, 1), jnp.float32),
        grid=(num_tiles,),
        in_specs=[
            pl.BlockSpec((tile_n, c), lambda i: (i, 0)),   # logits tile
            pl.BlockSpec((tile_n, 1), lambda i: (i, 0)),   # labels tile
        ],
        out_specs=pl.BlockSpec((8, 1), lambda i: (i, 0)),  # per-tile partial sum
        compiler_params=pltpu.CompilerParams(
            dimension_semantics=("parallel",),
            vmem_limit_bytes=48 * 1024 * 1024,
        ),
        cost_estimate=cost,
    )(x, t2)

    # Rows 1-7 of each per-tile block are exactly 0; divide by the true N.
    return jnp.sum(per_tile) / jnp.float32(n)


def _reference(x, target, smoothing=0.1):
    confidence = 1.0 - smoothing
    logprobs = jax.nn.log_softmax(x.astype(jnp.float32), axis=-1)
    nll = -jnp.take_along_axis(
        logprobs, target[:, None].astype(jnp.int32), axis=-1)[:, 0]
    smooth = -jnp.mean(logprobs, axis=-1)
    return jnp.mean(confidence * nll + smoothing * smooth)


if __name__ == "__main__":
    key = jax.random.PRNGKey(0)
    kx, kt, kx2, kt2 = jax.random.split(key, 4)

    # Small canonical case: batch of 8 samples, 32 classes.
    N, C = 8, 32
    x = jax.random.normal(kx, (N, C), dtype=jnp.float32)
    target = jax.random.randint(kt, (N,), 0, C, dtype=jnp.int32)

    loss = label_smoothing_cross_entropy(x, target, smoothing=0.1)
    loss = jax.block_until_ready(loss)
    ref = _reference(x, target, smoothing=0.1)
    assert jnp.allclose(loss, ref, atol=1e-5, rtol=1e-5), (loss, ref)

    # Ragged multi-tile case: N=13 with TILE_N=8 exercises the masked tail
    # and the per-tile partial-sum path with num_tiles=2.
    N2, C2 = 13, 32
    x2 = jax.random.normal(kx2, (N2, C2), dtype=jnp.float32)
    target2 = jax.random.randint(kt2, (N2,), 0, C2, dtype=jnp.int32)

    loss2 = label_smoothing_cross_entropy(x2, target2, smoothing=0.1, tile_n=8)
    loss2 = jax.block_until_ready(loss2)
    ref2 = _reference(x2, target2, smoothing=0.1)
    assert jnp.allclose(loss2, ref2, atol=1e-5, rtol=1e-5), (loss2, ref2)

    print("KERNEL_OK")
</pallas_src>

<mosaic_0001>
module attributes {stable_mosaic.version = 11 : i64} {
  func.func @_ls_ce_kernel(%arg0: i32, %arg1: memref<8x32xf32, #tpu.memory_space<vmem>>, %arg2: memref<8x1xi32, #tpu.memory_space<vmem>>, %arg3: memref<8x1xf32, #tpu.memory_space<vmem>>) attributes {dimension_semantics = [#tpu.dimension_semantics<parallel>], iteration_bounds = array<i64: 1>, scalar_prefetch = 0 : i64, scratch_operands = 0 : i64, tpu.core_type = #tpu.core_type<tc>, window_params = [{transform_indices = @transform_0, window_bounds = array<i64: 8, 32>}, {transform_indices = @transform_1, window_bounds = array<i64: 8, 1>}, {transform_indices = @transform_2, window_bounds = array<i64: 8, 1>}]} {
    %c0 = arith.constant 0 : index
    %c0_0 = arith.constant 0 : index
    %0 = vector.load %arg1[%c0, %c0_0] : memref<8x32xf32, #tpu.memory_space<vmem>>, vector<8x32xf32>
    %cst = arith.constant dense<0xFF800000> : vector<8xf32>
    %1 = vector.multi_reduction <maximumf>, %0, %cst [1] : vector<8x32xf32> to vector<8xf32>
    %2 = vector.shape_cast %1 : vector<8xf32> to vector<8x1xf32>
    %3 = vector.broadcast %2 : vector<8x1xf32> to vector<8x32xf32>
    %4 = arith.subf %0, %3 : vector<8x32xf32>
    %5 = math.exp %4 : vector<8x32xf32>
    %cst_1 = arith.constant dense<0.000000e+00> : vector<8xf32>
    %6 = vector.multi_reduction <add>, %5, %cst_1 [1] : vector<8x32xf32> to vector<8xf32>
    %7 = vector.shape_cast %6 : vector<8xf32> to vector<8x1xf32>
    %8 = math.log %7 : vector<8x1xf32>
    %9 = arith.addf %2, %8 : vector<8x1xf32>
    %10 = tpu.iota {dimensions = array<i32: 1>} : vector<8x32xi32>
    %c0_2 = arith.constant 0 : index
    %c0_3 = arith.constant 0 : index
    %11 = vector.load %arg2[%c0_2, %c0_3] : memref<8x1xi32, #tpu.memory_space<vmem>>, vector<8x1xi32>
    %12 = vector.broadcast %11 : vector<8x1xi32> to vector<8x32xi32>
    %13 = arith.cmpi eq, %10, %12 : vector<8x32xi32>
    %cst_4 = arith.constant 0.903124988 : f32
    %cst_5 = arith.constant 3.125000e-03 : f32
    %14 = vector.broadcast %cst_4 : f32 to vector<8x32xf32>
    %15 = vector.broadcast %cst_5 : f32 to vector<8x32xf32>
    %16 = arith.select %13, %14, %15 : vector<8x32xi1>, vector<8x32xf32>
    %17 = arith.mulf %0, %16 : vector<8x32xf32>
    %cst_6 = arith.constant dense<0.000000e+00> : vector<8xf32>
    %18 = vector.multi_reduction <add>, %17, %cst_6 [1] : vector<8x32xf32> to vector<8xf32>
    %19 = vector.shape_cast %18 : vector<8xf32> to vector<8x1xf32>
    %20 = arith.subf %9, %19 : vector<8x1xf32>
    %21 = tpu.iota {dimensions = array<i32: 0>} : vector<8x1xi32>
    %c8_i32 = arith.constant 8 : i32
    %22 = arith.muli %arg0, %c8_i32 : i32
    %23 = vector.broadcast %22 : i32 to vector<8x1xi32>
    %24 = arith.addi %21, %23 : vector<8x1xi32>
    %c8_i32_7 = arith.constant 8 : i32
    %25 = vector.broadcast %c8_i32_7 : i32 to vector<8x1xi32>
    %26 = arith.cmpi slt, %24, %25 : vector<8x1xi32>
    %cst_8 = arith.constant 0.000000e+00 : f32
    %27 = vector.broadcast %cst_8 : f32 to vector<8x1xf32>
    %28 = arith.select %26, %20, %27 : vector<8x1xi1>, vector<8x1xf32>
    %cst_9 = arith.constant dense<0.000000e+00> : vector<1xf32>
    %29 = vector.multi_reduction <add>, %28, %cst_9 [0] : vector<8x1xf32> to vector<1xf32>
    %30 = vector.shape_cast %29 : vector<1xf32> to vector<1x1xf32>
    %31 = tpu.iota {dimensions = array<i32: 0>} : vector<8x1xi32>
    %c0_i32 = arith.constant 0 : i32
    %32 = vector.broadcast %c0_i32 : i32 to vector<8x1xi32>
    %33 = arith.cmpi eq, %31, %32 : vector<8x1xi32>
    %cst_10 = arith.constant 0.000000e+00 : f32
    %34 = vector.shape_cast %30 : vector<1x1xf32> to vector<1x1xf32>
    %35 = vector.broadcast %34 : vector<1x1xf32> to vector<8x1xf32>
    %36 = vector.broadcast %cst_10 : f32 to vector<8x1xf32>
    %37 = arith.select %33, %35, %36 : vector<8x1xi1>, vector<8x1xf32>
    %c0_11 = arith.constant 0 : index
    %c0_12 = arith.constant 0 : index
    %38 = vector.load %arg3[%c0_11, %c0_12] : memref<8x1xf32, #tpu.memory_space<vmem>>, vector<8x1xf32>
    tpu.vector_store %arg3[%c0_11, %c0_12], %37 {strides = array<i32>} : memref<8x1xf32, #tpu.memory_space<vmem>>, vector<8x1xf32>,
    return
  }
  func.func @transform_0(%arg0: i32) -> (i32, i32) {
    %c0_i32 = arith.constant 0 : i32
    %c0_i32_0 = arith.constant 0 : i32
    return %arg0, %c0_i32 : i32, i32
  }
  func.func @transform_1(%arg0: i32) -> (i32, i32) {
    %c0_i32 = arith.constant 0 : i32
    %c0_i32_0 = arith.constant 0 : i32
    return %arg0, %c0_i32 : i32, i32
  }
  func.func @transform_2(%arg0: i32) -> (i32, i32) {
    %c0_i32 = arith.constant 0 : i32
    %c0_i32_0 = arith.constant 0 : i32
    return %arg0, %c0_i32 : i32, i32
  }
}

</mosaic_0001>

<bundles_post_ra>
// kernel: tpu_custom_call.1
= control target key start
LH: loop header
LB: loop body
LE: loop exit
PB: predicated region body
PF: predicated region fallthrough
CT: control target
= control target key end

     0   :  { %vm12_vm0 = vcmask 261120   ;;  %v66_v1 = vmov 0   ;;  %v25_v6 = vlaneseq  ;;  %v67_v10 = vmov 0.003125   ;;  %s95_s0 = inlined_call_operand.vmem [shape: f32[8,32], index: 0, kind: input, shape index: {}]   ;;  %s96_s1 = inlined_call_operand.vmem [shape: s32[8,1], index: 1, kind: input, shape index: {}]   ;;  %s97_s2 = inlined_call_operand.vmem [shape: f32[8,1], index: 2, kind: output, shape index: {}]  }
   0x1   :  { %v11_v0 = vld [vmem:[%s95_s0] sm:$0xff]  ;;  %61 = vset.pattern.permute.xlu0 %v66_v1  ;;  %vm53_vm3 = vcmask 7168  }
   0x2   :  { %v13_v2 = vsel %vm12_vm0, %v11_v0, -inf  ;;  %v27_v3 = vld [vmem:[%s96_s1] sm:$0xff]  ;;  %v26_v8 = vand.u32 127, %v25_v6  ;;  %v39_v25 = vshrl.u32 %v25_v6, 7 }
   0x3   :  { %14 = vmax.xlane.f32.xlu0 %v13_v2 }
   0x4   :  { %vm51_vm2 = vcmp.eq.s32.totalorder %v39_v25, 0 }
  0x19   :  { %29 = vperm.xlu0 %61, %v27_v3  }
  0x90   :  { %v15_v4 = vpop.xlane.xlu0 %14 }
  0x91   :  { %v16_v5 = vsub.f32 %v11_v0, %v15_v4 }
  0x93   :  { %v17_v7 = vmul.f32 1.442695, %v16_v5 }
  0x95   :  { %62 = vpow2.f32 %v17_v7 }
  0x98   :  { %v30_v9 = vpop.permute.xlu0 %29 }
  0x99   :  { %vm31_vm1 = vcmp.eq.s32.totalorder %v26_v8, %v30_v9 }
  0x9a   :  { %v32_v11 = vsel %vm31_vm1, 0.903125, %v67_v10 }
  0x9b   :  { %v33_v12 = vmul.f32 %v32_v11, %v11_v0 }
  0x9d   :  { %v34_v15 = vsel %vm12_vm0, %v33_v12, 0.0 }
  0x9f   :  { %v63_v13 = vpop.eup %62 }
  0xa0   :  { %v19_v14 = vsel %vm12_vm0, %v63_v13, 0.0 }
  0xa1   :  { %20 = vadd.xlane.f32.xlu1 %v19_v14 }
  0xa5   :  { %35 = vadd.xlane.f32.xlu1 %v34_v15 }
 0x12e   :  { %v21_v16 = vpop.xlane.xlu1 %20 }
 0x12f   :  { %64 = vlog2.f32 %v21_v16 }
 0x132   :  { %v36_v19 = vpop.xlane.xlu1 %35 }
 0x139   :  { %v65_v17 = vpop.eup %64 }
 0x13a   :  { %v23_v18 = vmul.f32 0.6931472, %v65_v17 }
 0x13c   :  { %v24_v20 = vadd.f32 %v23_v18, %v15_v4 }
 0x13e   :  { %v37_v21 = vsub.f32 %v24_v20, %v36_v19 }
 0x140   :  { %v45_v22 = vrot.slane %v37_v21, 4 }
 0x142   :  { %v46_v23 = vadd.f32 %v45_v22, %v37_v21 }
 0x144   :  { %v47_v24 = vrot.slane %v46_v23, 2 }
 0x146   :  { %v48_v26 = vadd.f32 %v47_v24, %v46_v23 }
 0x148   :  { %v49_v27 = vrot.slane %v48_v26, 1 }
 0x14a   :  { %v50_v28 = vadd.f32 %v49_v27, %v48_v26 }
 0x14c   :  { %v52_v29 = vsel %vm51_vm2, %v50_v28, 0.0 }
 0x14d   :  { %54 = vst.msk [vmem:[%s97_s2] sm:$0xff] %vm53_vm3, %v52_v29 }

</bundles_post_ra>
